<compile_context>
chip_gen: v7x
topology: tpu7x:2x2x1
jax: 0.10.0
libtpu: 0.0.40
codegen_flags: <defaults>
</compile_context>

<pallas_src>
from functools import partial

import jax
import jax.numpy as jnp
from jax.experimental import pallas as pl
from jax.experimental.pallas import tpu as pltpu


# ---------------------------------------------------------------------------
# Tiled path: group dims are lane-aligned (gd % 128 == 0 and gf % 128 == 0).
# ---------------------------------------------------------------------------
def _group_linear_tiled_kernel(x_ref, w_ref, b_ref, o_ref):
    # x_ref: (TILE_M, gd)    w_ref: (1, gd, gf)
    # b_ref: (1, gf)         o_ref: (TILE_M, gf)
    acc = jnp.dot(
        x_ref[...].astype(jnp.bfloat16),      # bf16 feed, f32 accumulate
        w_ref[0].astype(jnp.bfloat16),
        preferred_element_type=jnp.float32,
    )
    o_ref[...] = (acc + b_ref[...].astype(jnp.float32)).astype(o_ref.dtype)


def _round_up(x, m):
    return ((x + m - 1) // m) * m


def _pick_tile_m(M, gd, gf):
    # Fit double-buffered x / W / out tiles under ~8 MiB (f32-byte estimate,
    # conservative for every TPU generation's default scoped-VMEM limit).
    budget = 8 * 1024 * 1024
    tile = 1024
    while tile > 8:
        need = 2 * (tile * gd * 4 + gd * gf * 4 + tile * gf * 4)
        if need <= budget:
            break
        tile //= 2
    return max(8, min(tile, _round_up(M, 8)))


def _group_linear_tiled(x2, group_weight, bias2, groups, gd, gf):
    M, d = x2.shape
    out_dim = groups * gf

    tile_m = _pick_tile_m(M, gd, gf)
    M_pad = _round_up(M, tile_m)
    xp = x2 if M_pad == M else jnp.pad(x2, ((0, M_pad - M), (0, 0)))
    m_tiles = M_pad // tile_m

    out = pl.pallas_call(
        _group_linear_tiled_kernel,
        out_shape=jax.ShapeDtypeStruct((M_pad, out_dim), x2.dtype),
        grid_spec=pltpu.PrefetchScalarGridSpec(
            num_scalar_prefetch=0,
            grid=(groups, m_tiles),               # W resident across inner m
            in_specs=[
                pl.BlockSpec((tile_m, gd), lambda g, m: (m, g)),      # x tile
                pl.BlockSpec((1, gd, gf), lambda g, m: (g, 0, 0)),    # W[g]
                pl.BlockSpec((1, gf), lambda g, m: (0, g)),           # bias[g]
            ],
            out_specs=pl.BlockSpec((tile_m, gf), lambda g, m: (m, g)),
        ),
        compiler_params=pltpu.CompilerParams(
            dimension_semantics=("parallel", "parallel"),
        ),
    )(xp, group_weight, bias2)

    return out if M_pad == M else out[:M]


# ---------------------------------------------------------------------------
# Grid-less small path: whole slab in one invocation (sub-MXU shapes).
# ---------------------------------------------------------------------------
def _group_linear_small_kernel(x_ref, w_ref, b_ref, o_ref, *, groups, gd, gf):
    # x_ref: (M, d)   w_ref: (groups, gd, gf)   b_ref: (1, out_dim)
    # o_ref: (M, out_dim)
    x = x_ref[...]
    parts = []
    for g in range(groups):                       # static unroll (small groups)
        xg = x[:, g * gd:(g + 1) * gd]
        parts.append(jnp.dot(xg, w_ref[g], preferred_element_type=jnp.float32))
    out = jnp.concatenate(parts, axis=-1) + b_ref[...]
    o_ref[...] = out.astype(o_ref.dtype)


def _group_linear_small(x2, group_weight, bias2, groups, gd, gf):
    M, _ = x2.shape
    out_dim = groups * gf
    kernel = partial(_group_linear_small_kernel, groups=groups, gd=gd, gf=gf)
    # No grid: whole arrays are placed in VMEM and the kernel runs once.
    return pl.pallas_call(
        kernel,
        out_shape=jax.ShapeDtypeStruct((M, out_dim), x2.dtype),
    )(x2, group_weight, bias2)


# ---------------------------------------------------------------------------
# Public wrapper matching the PyTorch forward semantics.
# ---------------------------------------------------------------------------
def group_linear(x, group_weight, group_bias, groups):
    """x: (t, b, d); group_weight: (groups, gd, gf); group_bias: (groups*gf,)."""
    t, b, d = x.shape
    g, gd, gf = group_weight.shape
    assert g == groups and d == groups * gd
    out_dim = groups * gf
    assert group_bias.shape == (out_dim,)
    M = t * b

    x2 = x.reshape(M, d)                      # free view, no HBM transpose
    bias2 = group_bias.reshape(1, out_dim)

    lane_aligned = (gd % 128 == 0) and (gf % 128 == 0)
    if lane_aligned:
        out2 = _group_linear_tiled(x2, group_weight, bias2, groups, gd, gf)
    else:
        slab_bytes = (M * d + M * out_dim + groups * gd * gf) * x.dtype.itemsize
        if slab_bytes <= 12 * 1024 * 1024:
            out2 = _group_linear_small(x2, group_weight, bias2, groups, gd, gf)
        else:
            # TODO(synk): large non-128-aligned group dims need a padded-lane
            # tiled kernel; fall back to XLA einsum there (reviewer-endorsed).
            out2 = (
                jnp.einsum("mgd,gdf->mgf", x2.reshape(M, groups, gd), group_weight)
                .reshape(M, out_dim)
                + group_bias
            )
    return out2.reshape(t, b, out_dim)


# ---------------------------------------------------------------------------
# Self-test
# ---------------------------------------------------------------------------
if __name__ == "__main__":
    key = jax.random.PRNGKey(0)

    # --- Small config (matches the module's toy use): t=8, b=2, 32->32, groups=4
    t, b = 8, 2
    in_planes, out_channels, groups = 32, 32, 4
    gd, gf = in_planes // groups, out_channels // groups

    k1, k2, k3, k4, k5, k6 = jax.random.split(key, 6)
    x = jax.random.normal(k1, (t, b, in_planes), dtype=jnp.float32)
    w = jax.random.normal(k2, (groups, gd, gf), dtype=jnp.float32) * 0.1
    bias = jax.random.normal(k3, (out_channels,), dtype=jnp.float32) * 0.1

    out = jax.block_until_ready(group_linear(x, w, bias, groups))
    ref = jnp.einsum("tbgd,gdf->tbgf", x.reshape(t, b, groups, gd), w).reshape(
        t, b, out_channels
    ) + bias
    assert out.shape == (t, b, out_channels)
    assert jnp.allclose(out, ref, atol=1e-5, rtol=1e-5), "small-path mismatch"

    # --- Lane-aligned config exercising the tiled bf16 MXU path:
    #     t=32, b=8, 512->512, groups=4 (gd=gf=128).
    t2, b2 = 32, 8
    in2, out2c, groups2 = 512, 512, 4
    gd2, gf2 = in2 // groups2, out2c // groups2
    x_l = jax.random.normal(k4, (t2, b2, in2), dtype=jnp.float32)
    w_l = jax.random.normal(k5, (groups2, gd2, gf2), dtype=jnp.float32) * 0.1
    bias_l = jax.random.normal(k6, (out2c,), dtype=jnp.float32) * 0.1

    out_l = jax.block_until_ready(group_linear(x_l, w_l, bias_l, groups2))
    ref_l = jnp.einsum(
        "tbgd,gdf->tbgf", x_l.reshape(t2, b2, groups2, gd2), w_l
    ).reshape(t2, b2, out2c) + bias_l
    assert out_l.shape == (t2, b2, out2c)
    # bf16 MXU feed with f32 accumulation -> loosen tolerance accordingly.
    assert jnp.allclose(out_l, ref_l, atol=8e-2, rtol=5e-2), "tiled-path mismatch"

    print("KERNEL_OK")
</pallas_src>

<mosaic_0001>
module attributes {stable_mosaic.version = 11 : i64} {
  func.func @_group_linear_small_kernel(%arg0: memref<16x32xf32, #tpu.memory_space<vmem>>, %arg1: memref<4x8x8xf32, #tpu.memory_space<vmem>>, %arg2: memref<1x32xf32, #tpu.memory_space<vmem>>, %arg3: memref<16x32xf32, #tpu.memory_space<vmem>>) attributes {dimension_semantics = [], scalar_prefetch = 0 : i64, scratch_operands = 0 : i64, tpu.core_type = #tpu.core_type<tc>} {
    %c0 = arith.constant 0 : index
    %c0_0 = arith.constant 0 : index
    %0 = vector.load %arg0[%c0, %c0_0] : memref<16x32xf32, #tpu.memory_space<vmem>>, vector<16x32xf32>
    %1 = vector.extract_strided_slice %0 {offsets = [0, 0], sizes = [16, 8], strides = [1, 1]} : vector<16x32xf32> to vector<16x8xf32>
    %c0_1 = arith.constant 0 : index
    %c0_2 = arith.constant 0 : index
    %c0_3 = arith.constant 0 : index
    %2 = vector.load %arg1[%c0_1, %c0_2, %c0_3] : memref<4x8x8xf32, #tpu.memory_space<vmem>>, vector<1x8x8xf32>
    %3 = vector.shape_cast %2 : vector<1x8x8xf32> to vector<8x8xf32>
    %cst = arith.constant dense<0.000000e+00> : vector<16x8xf32>
    %4 = tpu.matmul %1, %3, %cst {dimension_numbers = #tpu.dot_dimension_numbers<[1], [0], [0], [1], [0, 0, 1, 1], [], []>} : vector<16x8xf32>, vector<8x8xf32>, vector<16x8xf32> -> vector<16x8xf32>
    %5 = vector.extract_strided_slice %0 {offsets = [0, 8], sizes = [16, 8], strides = [1, 1]} : vector<16x32xf32> to vector<16x8xf32>
    %c1 = arith.constant 1 : index
    %c0_4 = arith.constant 0 : index
    %c0_5 = arith.constant 0 : index
    %6 = vector.load %arg1[%c1, %c0_4, %c0_5] : memref<4x8x8xf32, #tpu.memory_space<vmem>>, vector<1x8x8xf32>
    %7 = vector.shape_cast %6 : vector<1x8x8xf32> to vector<8x8xf32>
    %cst_6 = arith.constant dense<0.000000e+00> : vector<16x8xf32>
    %8 = tpu.matmul %5, %7, %cst_6 {dimension_numbers = #tpu.dot_dimension_numbers<[1], [0], [0], [1], [0, 0, 1, 1], [], []>} : vector<16x8xf32>, vector<8x8xf32>, vector<16x8xf32> -> vector<16x8xf32>
    %9 = vector.extract_strided_slice %0 {offsets = [0, 16], sizes = [16, 8], strides = [1, 1]} : vector<16x32xf32> to vector<16x8xf32>
    %c2 = arith.constant 2 : index
    %c0_7 = arith.constant 0 : index
    %c0_8 = arith.constant 0 : index
    %10 = vector.load %arg1[%c2, %c0_7, %c0_8] : memref<4x8x8xf32, #tpu.memory_space<vmem>>, vector<1x8x8xf32>
    %11 = vector.shape_cast %10 : vector<1x8x8xf32> to vector<8x8xf32>
    %cst_9 = arith.constant dense<0.000000e+00> : vector<16x8xf32>
    %12 = tpu.matmul %9, %11, %cst_9 {dimension_numbers = #tpu.dot_dimension_numbers<[1], [0], [0], [1], [0, 0, 1, 1], [], []>} : vector<16x8xf32>, vector<8x8xf32>, vector<16x8xf32> -> vector<16x8xf32>
    %13 = vector.extract_strided_slice %0 {offsets = [0, 24], sizes = [16, 8], strides = [1, 1]} : vector<16x32xf32> to vector<16x8xf32>
    %c3 = arith.constant 3 : index
    %c0_10 = arith.constant 0 : index
    %c0_11 = arith.constant 0 : index
    %14 = vector.load %arg1[%c3, %c0_10, %c0_11] : memref<4x8x8xf32, #tpu.memory_space<vmem>>, vector<1x8x8xf32>
    %15 = vector.shape_cast %14 : vector<1x8x8xf32> to vector<8x8xf32>
    %cst_12 = arith.constant dense<0.000000e+00> : vector<16x8xf32>
    %16 = tpu.matmul %13, %15, %cst_12 {dimension_numbers = #tpu.dot_dimension_numbers<[1], [0], [0], [1], [0, 0, 1, 1], [], []>} : vector<16x8xf32>, vector<8x8xf32>, vector<16x8xf32> -> vector<16x8xf32>
    %17 = tpu.concatenate %4, %8, %12, %16 in 1 : vector<16x8xf32>, vector<16x8xf32>, vector<16x8xf32>, vector<16x8xf32> -> vector<16x32xf32>
    %c0_13 = arith.constant 0 : index
    %c0_14 = arith.constant 0 : index
    %18 = vector.load %arg2[%c0_13, %c0_14] : memref<1x32xf32, #tpu.memory_space<vmem>>, vector<1x32xf32>
    %19 = vector.broadcast %18 : vector<1x32xf32> to vector<16x32xf32>
    %20 = arith.addf %17, %19 : vector<16x32xf32>
    %c0_15 = arith.constant 0 : index
    %c0_16 = arith.constant 0 : index
    %21 = vector.load %arg3[%c0_15, %c0_16] : memref<16x32xf32, #tpu.memory_space<vmem>>, vector<16x32xf32>
    tpu.vector_store %arg3[%c0_15, %c0_16], %20 {strides = array<i32>} : memref<16x32xf32, #tpu.memory_space<vmem>>, vector<16x32xf32>,
    return
  }
}

</mosaic_0001>

<bundles_post_ra>
// kernel: tpu_custom_call.1
= control target key start
LH: loop header
LB: loop body
LE: loop exit
PB: predicated region body
PF: predicated region fallthrough
CT: control target
= control target key end

     0   :  { %8 = vsyncpa [#allocation3], 0  ;;  %s658_s0 = inlined_call_operand.hbm [shape: f32[16,32], index: 0, kind: input, shape index: {}]   ;;  %s659_s1 = inlined_call_operand.hbm [shape: f32[4,8,8], index: 1, kind: input, shape index: {}]   ;;  %s660_s2 = inlined_call_operand.vmem [shape: f32[1,32], index: 2, kind: input, shape index: {}]   ;;  %s661_s3 = inlined_call_operand.hbm [shape: f32[16,32], index: 3, kind: output, shape index: {}]  }
   0x1   :  { %9 = vsyncpa [#allocation6], 0 }
   0x2   :  { %10 = vsyncpa [#allocation4], 0  ;;  %s568_s12 = smov [#allocation2]   ;;  %s496_s16 = scalar_lea.hbm %s658_s0, 256 }
   0x3   :  { %s16_s13 = sshll.u32 %s568_s12, 4  ;;  %p497_p0 = scmp.ne.s32.totalorder %s658_s0, %s496_s16  ;;  %s17_s13 = int_to_ptr.vmem [resolvable:$true] %s16_s13 }
   0x4   :  { %p500_p1 = scmp.lt.u32.totalorder %s496_s16, %s658_s0 }
   0x6   :  { %p502_p2 = pnand %p500_p1, %p497_p0 }
   0x8   :  { %505 = shalt.err (!%p502_p2)
}
   0x9   :  { %s506_s21 = scalar_lea.vmem %s17_s13, 256  ;;  %p511_p4 = scmp.lt.s32.totalorder %s17_s13, %s17_s13 }
   0xa   :  { %p507_p3 = scmp.ne.s32.totalorder %s17_s13, %s506_s21  ;;  %p512_p5 = scmp.lt.s32.totalorder %s506_s21, %s506_s21 }
   0xc   :  { %p513_p6 = por %p512_p5, %p511_p4 }
   0xe   :  { %p514_p7 = pnand %p513_p6, %p507_p3 }
  0x10   :  { %517 = shalt.err (!%p514_p7)
}
  0x11   :  { %s569_s22 = smov 128   ;;  %s570_s23 = smov 8  }
  0x12   :  { %22 = dma.hbm_to_vmem [thread:$0]  %s658_s0, 256, %s17_s13, [#allocation3], %s569_s22, %s569_s22, %s570_s23  }
  0x13   :  { %s571_s26 = smov [#allocation5]   ;;  %s518_s30 = scalar_lea.hbm %s659_s1, 512 }
  0x14   :  { %s28_s27 = sshll.u32 %s571_s26, 4  ;;  %p519_p8 = scmp.ne.s32.totalorder %s659_s1, %s518_s30  ;;  %s29_s27 = int_to_ptr.vmem [resolvable:$true] %s28_s27 }
  0x15   :  { %p522_p9 = scmp.lt.u32.totalorder %s518_s30, %s659_s1 }
  0x17   :  { %p524_p10 = pnand %p522_p9, %p519_p8 }
  0x19   :  { %527 = shalt.err (!%p524_p10)
}
  0x1a   :  { %s528_s8 = scalar_lea.vmem %s29_s27, 512  ;;  %p533_p12 = scmp.lt.s32.totalorder %s29_s27, %s29_s27 }
  0x1b   :  { %p529_p11 = scmp.ne.s32.totalorder %s29_s27, %s528_s8  ;;  %p534_p13 = scmp.lt.s32.totalorder %s528_s8, %s528_s8 }
  0x1d   :  { %p535_p0 = por %p534_p13, %p533_p12 }
  0x1f   :  { %p536_p1 = pnand %p535_p0, %p529_p11 }
  0x21   :  { %539 = shalt.err (!%p536_p1)
}
  0x22   :  { %34 = dma.hbm_to_vmem [thread:$0]  %s659_s1, 512, %s29_s27, [#allocation6], %s569_s22, %s569_s22, %s570_s23  }
  0x23   :  { %562 = dma.done.wait [#allocation3], 256  }
  0x24   :  { %563 = vsyncadd [#allocation3], 4294967040 }
  0x25   :  { %564 = dma.done.wait [#allocation6], 512  }
  0x26   :  { %565 = vsyncadd [#allocation6], 4294966784  ;;  %v43_v0 = vld [vmem:[#allocation2] sm:$0xff]  ;;  %v45_v1 = vld [vmem:[#allocation5] sm:$0xff]  ;;  %s572_s10 = smov 120   ;;  %s573_s11 = smov 112  }
  0x27   :  { %130 = vrot.lane.b32.xlu0 %v43_v0, %s572_s10  ;;  %215 = vrot.lane.b32.xlu1 %v43_v0, %s573_s11  ;;  %v129_v2 = vld [vmem:[#allocation5 + $0x8] sm:$0xff]  ;;  %v214_v3 = vld [vmem:[#allocation5 + $0x10] sm:$0xff]  ;;  %v44_v4 = vld [vmem:[#allocation2 + $0x8] sm:$0xff]  ;;  %vm46_vm0 = vcmask 64512   ;;  %s574_s1 = smov 104   ;;  %s575_s12 = smov 16  }
  0x28   :  { %466 = vmatprep.subr.mxu0 %v45_v1  ;;  %471 = vmatprep.subr.mxu1 %v129_v2  ;;  %v299_v5 = vld [vmem:[#allocation5 + $0x18] sm:$0xff]  ;;  %s576_s13 = smov 24   ;;  %vm409_vm1 = vcmask 130048   ;;  %vm412_vm2 = vcmask 195584   ;;  %v453_v25 = vld [vmem:[%s660_s2] ss:$0 sm:$0xff] }
  0x29   :  { %467 = vmatpush3.msra.mxu0 %v45_v1  ;;  %468 = vmatprep.mubr.msk.f32.mxu0 %vm46_vm0, %v43_v0  ;;  %s577_s16 = smov [#allocation7]   ;;  %vm424_vm3 = vcmask 261120  }
  0x2a   :  { %472 = vmatpush3.msra.mxu1 %v129_v2  ;;  %476 = vmatprep.subr.mxu0 %v214_v3  ;;  %s432_s17 = sshll.u32 %s577_s16, 4  ;;  %s433_s17 = int_to_ptr.vmem [resolvable:$true] %s432_s17 }
  0x2b   :  { %132 = vrot.lane.b32.xlu0 %v44_v4, %s572_s10  ;;  %217 = vrot.lane.b32.xlu1 %v44_v4, %s573_s11  ;;  %s540_s18 = scalar_lea.vmem %s433_s17, 256  ;;  %p545_p3 = scmp.lt.s32.totalorder %s433_s17, %s433_s17 }
  0x2c   :  { %469 = vmatmul.mubr.msk.f32.vlgmr.msra.gmra.mrb[0].mxu0 %vm46_vm0, %v44_v4  ;;  %481 = vmatprep.subr.mxu1 %v299_v5  ;;  %p541_p2 = scmp.ne.s32.totalorder %s433_s17, %s540_s18  ;;  %p546_p4 = scmp.lt.s32.totalorder %s540_s18, %s540_s18 }
  0x2d   :  { %477 = vmatpush3.msra.mxu0 %v214_v3 }
  0x2e   :  { %p547_p5 = por %p546_p4, %p545_p3 }
  0x2f   :  { %300 = vrot.lane.b32.xlu0 %v43_v0, %s574_s1  ;;  %302 = vrot.lane.b32.xlu1 %v44_v4, %s574_s1 }
  0x30   :  { %p548_p6 = pnand %p547_p5, %p541_p2 }
  0x99   :  { %v131_v6 = vpop.permute.xlu0 %130  ;;  %v216_v7 = vpop.permute.xlu1 %215 }
  0x9a   :  { %473 = vmatprep.mubr.msk.f32.mxu1 %vm46_vm0, %v131_v6  ;;  %478 = vmatprep.mubr.msk.f32.mxu0 %vm46_vm0, %v216_v7 }
  0x9d   :  { %v133_v8 = vpop.permute.xlu0 %132  ;;  %v218_v9 = vpop.permute.xlu1 %217 }
  0x9e   :  { %474 = vmatmul.mubr.msk.f32.vlgmr.msra.gmra.mrb[0].mxu1 %vm46_vm0, %v133_v8  ;;  %479 = vmatmul.mubr.msk.f32.vlgmr.msra.gmra.mrb[2].mxu0 %vm46_vm0, %v218_v9 }
  0x9f   :  { %482 = vmatpush3.msra.mxu1 %v299_v5 }
  0xa1   :  { %v301_v10 = vpop.permute.xlu0 %300  ;;  %v303_v11 = vpop.permute.xlu1 %302 }
  0xa2   :  { %483 = vmatprep.mubr.msk.f32.mxu1 %vm46_vm0, %v301_v10 }
  0xa3   :  { %484 = vmatmul.mubr.msk.f32.vlgmr.msra.gmra.mrb[2].mxu1 %vm46_vm0, %v303_v11 }
  0xff   :  { %v470_v12 = vpop.f32.mrb[0].mxu0 }
 0x100   :  { %v119_v13 = vpop.f32.mrb[1].mxu0 }
 0x171   :  { %v475_v14 = vpop.f32.mrb[0].mxu1  ;;  %v480_v15 = vpop.f32.mrb[2].mxu0 }
 0x172   :  { %387 = vrot.lane.b32.xlu1 %v475_v14, %s570_s23  ;;  %v204_v16 = vpop.f32.mrb[1].mxu1  ;;  %v289_v17 = vpop.f32.mrb[3].mxu0 }
 0x173   :  { %385 = vrot.lane.b32.xlu0 %v204_v16, %s570_s23 }
 0x176   :  { %395 = vrot.lane.b32.xlu1 %v480_v15, %s575_s12  ;;  %v485_v18 = vpop.f32.mrb[2].mxu1 }
 0x177   :  { %393 = vrot.lane.b32.xlu0 %v289_v17, %s575_s12  ;;  %v374_v19 = vpop.f32.mrb[3].mxu1 }
 0x17a   :  { %403 = vrot.lane.b32.xlu1 %v485_v18, %s576_s13 }
 0x17b   :  { %401 = vrot.lane.b32.xlu0 %v374_v19, %s576_s13 }
 0x1e4   :  { %v388_v20 = vpop.permute.xlu1 %387 }
 0x1e5   :  { %v386_v21 = vpop.permute.xlu0 %385  ;;  %v408_v24 = vsel %vm46_vm0, %v470_v12, %v388_v20 }
 0x1e6   :  { %v407_v26 = vsel %vm46_vm0, %v119_v13, %v386_v21 }
 0x1e8   :  { %v396_v22 = vpop.permute.xlu1 %395 }
 0x1e9   :  { %v394_v23 = vpop.permute.xlu0 %393  ;;  %v411_v27 = vsel %vm409_vm1, %v408_v24, %v396_v22 }
 0x1ea   :  { %v410_v29 = vsel %vm409_vm1, %v407_v26, %v394_v23 }
 0x1ec   :  { %v404_v28 = vpop.permute.xlu1 %403 }
 0x1ed   :  { %v414_v30 = vsel %vm412_vm2, %v411_v27, %v404_v28  ;;  %v402_v31 = vpop.permute.xlu0 %401 }
 0x1ee   :  { %v423_v32 = vadd.f32 %v453_v25, %v414_v30  ;;  %v413_v33 = vsel %vm412_vm2, %v410_v29, %v402_v31 }
 0x1ef   :  { %v422_v34 = vadd.f32 %v453_v25, %v413_v33 }
 0x1f0   :  { %426 = vst.msk [vmem:[#allocation7 + $0x8] sm:$0xff] %vm424_vm3, %v423_v32 }
 0x1f1   :  { %425 = vst.msk [vmem:[#allocation7] sm:$0xff] %vm424_vm3, %v422_v34 }
 0x1f2   :  { %551 = shalt.err (!%p548_p6)
}
 0x1f3   :  { %s552_s20 = scalar_lea.hbm %s661_s3, 256 }
 0x1f4   :  { %p553_p7 = scmp.ne.s32.totalorder %s661_s3, %s552_s20  ;;  %p556_p8 = scmp.lt.u32.totalorder %s552_s20, %s661_s3 }
 0x1f6   :  { %p558_p9 = pnand %p556_p8, %p553_p7 }
 0x1f8   :  { %561 = shalt.err (!%p558_p9)
}
 0x1f9   :  { %438 = dma.vmem_to_hbm [thread:$0]  %s433_s17, 256, %s661_s3, [#allocation4], %s569_s22, %s569_s22, %s570_s23  }
 0x1fa   :  { %566 = dma.done.wait [#allocation4], 256  }
 0x1fb   :  { %567 = vsyncadd [#allocation4], 4294967040 }
 0x1fc   :  { %442 = vsyncpa [#allocation3], 1 }
 0x1fd   :  { %443 = vsyncpa [#allocation6], 1 }
 0x1fe   :  { %444 = vsyncpa [#allocation4], 1 }

</bundles_post_ra>
